<compile_context>
chip_gen: v6e
topology: v6e:2x2x1
jax: 0.10.0
libtpu: 0.0.40
codegen_flags: <defaults>
</compile_context>

<pallas_src>
import functools

import jax
import jax.numpy as jnp
from jax.experimental import pallas as pl
from jax.experimental.pallas import tpu as pltpu


def _cdiv(a, b):
    return -(-a // b)


def _vmem_capacity_bytes():
    try:
        return int(pltpu.get_tpu_info().vmem_capacity_bytes)
    except Exception:
        return 64 * 1024 * 1024  # conservative (v7x-sized) fallback


def _tile_config(hw, c, itemsize, max_tile_bytes=None):
    """Pick the HW chunk width TK and a VMEM limit for this generation."""
    vmem_cap = _vmem_capacity_bytes()
    if max_tile_bytes is None:
        # ~8 MiB input tiles on 128-MiB-VMEM chips (v5e/v6e), ~4 MiB on v7x (64 MiB).
        max_tile_bytes = (8 if vmem_cap >= 100 * (1 << 20) else 4) * (1 << 20)
    tk = max_tile_bytes // max(1, c * itemsize)
    tk = max(128, (tk // 128) * 128)
    if tk >= hw:
        # One full-extent block: exempt from the 128 rule, no mask / pad needed.
        tk = hw
    elif hw % 128 != 0:
        # Keep the block strictly within the array; the last grid step masks the tail.
        tk = min(tk, (hw // 128) * 128)
    num_k = _cdiv(hw, tk)
    # double-buffered input + double-buffered (C,C) f32 output + internal-scratch slack
    vmem_need = 2 * c * tk * itemsize + 2 * c * c * 4 + (2 << 20)
    vmem_limit = min(max(vmem_need, 32 << 20), (vmem_cap * 3) // 4)
    return tk, num_k, vmem_limit


def _gram_kernel(x_ref, gram_ref, *, inv_norm, hw, tk, row_stride, need_mask):
    # x_ref:    (1, C, TK)  one HW chunk of one batch element (or HW half) of features
    # gram_ref: (1, C, C)   f32 output block, resident across the k (reduction) axis
    k = pl.program_id(1)

    @pl.when(k == 0)
    def _():
        gram_ref[...] = jnp.zeros_like(gram_ref)

    feats = x_ref[0]  # (C, TK), native input dtype
    if need_mask:
        # Absolute column offset of this chunk.  row_stride == 0 in batch mode
        # (program_id(0) is the batch index); == half_k in the B==1 split mode.
        start = (pl.program_id(0) * row_stride + k) * tk
        col = jax.lax.broadcasted_iota(jnp.int32, feats.shape, 1)
        feats = jnp.where(col < (hw - start), feats, jnp.zeros_like(feats))

    # G_partial = feats @ feats^T (contract over the TK axis), f32 MXU accumulation.
    gram_ref[0] += jax.lax.dot_general(
        feats,
        feats,
        dimension_numbers=(((1,), (1,)), ((), ())),
        preferred_element_type=jnp.float32,
    )

    @pl.when(k == pl.num_programs(1) - 1)
    def _():
        gram_ref[...] = gram_ref[...] * inv_norm


def gram_matrix(x, *, max_tile_bytes=None, downcast_to_bf16=False):
    """Pallas-computed per-batch gram matrices, (B, C, C) f32 == x.bmm / (C*H*W)."""
    B, C, H, W = x.shape
    HW = H * W
    feats = x.reshape(B, C, HW)
    if downcast_to_bf16 and feats.dtype == jnp.float32:
        # Halves HBM traffic (kernel is bandwidth bound); f32 accumulation on the MXU.
        feats = feats.astype(jnp.bfloat16)
    itemsize = jnp.dtype(feats.dtype).itemsize

    TK, num_k, vmem_limit = _tile_config(HW, C, itemsize, max_tile_bytes)
    tail = (HW % TK) != 0

    # For B == 1, split the HW reduction into two halves over a "parallel" leading grid
    # axis so both TensorCores (v7x megacore) stream half of HW each.
    split = (B == 1) and (num_k >= 2)
    if split:
        half_k = _cdiv(num_k, 2)
        grid = (2, half_k)
        out_rows = 2
        row_stride = half_k
        # Fully out-of-range blocks (odd num_k) are clamped here and fully masked
        # in-kernel, so they contribute exactly zero.
        in_map = lambda h, k: (0, 0, jnp.minimum(h * half_k + k, num_k - 1))
        need_mask = tail or (2 * half_k != num_k)
    else:
        grid = (B, num_k)
        out_rows = B
        row_stride = 0
        in_map = lambda b, k: (b, 0, k)
        need_mask = tail

    # TODO(synk): for small-C / large-B workloads, block several batch elements per grid
    # step (BB, C, TK) to amortize per-step overhead; not needed for typical VGG layers.

    kernel = functools.partial(
        _gram_kernel,
        inv_norm=1.0 / float(C * H * W),
        hw=HW,
        tk=TK,
        row_stride=row_stride,
        need_mask=need_mask,
    )

    gram = pl.pallas_call(
        kernel,
        out_shape=jax.ShapeDtypeStruct((out_rows, C, C), jnp.float32),
        grid_spec=pltpu.PrefetchScalarGridSpec(
            num_scalar_prefetch=0,
            grid=grid,
            in_specs=[pl.BlockSpec((1, C, TK), in_map)],
            out_specs=pl.BlockSpec((1, C, C), lambda i, k: (i, 0, 0)),
        ),
        compiler_params=pltpu.CompilerParams(
            dimension_semantics=("parallel", "arbitrary"),
            vmem_limit_bytes=int(vmem_limit),
        ),
    )(feats)

    if split:
        gram = gram.sum(axis=0, keepdims=True)  # (1, C, C)
    return gram


class StyleLoss:
    """JAX/Pallas equivalent of the PyTorch StyleLoss module."""

    def __init__(self, target_feature, *, downcast_to_bf16=False):
        self._downcast = downcast_to_bf16
        self.target = jax.lax.stop_gradient(
            gram_matrix(target_feature, downcast_to_bf16=downcast_to_bf16)
        )
        self.loss = None

    def __call__(self, x):
        G = gram_matrix(x, downcast_to_bf16=self._downcast)
        # Gram matrices are tiny (B*C*C); the MSE reduction is free in the wrapper.
        self.loss = jnp.mean((G - self.target) ** 2)
        return x  # forward passes input through unchanged


def _reference_gram(x):
    B, C, H, W = x.shape
    f = x.reshape(B, C, H * W).astype(jnp.float32)
    G = jnp.einsum("bij,bkj->bik", f, f, precision=jax.lax.Precision.HIGHEST)
    return G / (C * H * W)


if __name__ == "__main__":
    key = jax.random.PRNGKey(0)
    k1, k2, k3, k4 = jax.random.split(key, 4)

    # --- Primary check: module-level forward semantics (B=2, C=4, 16x16) ---
    B, C, H, W = 2, 4, 16, 16
    target_feature = jax.random.normal(k1, (B, C, H, W), dtype=jnp.float32)
    x = jax.random.normal(k2, (B, C, H, W), dtype=jnp.float32)

    style = StyleLoss(target_feature)
    out = jax.block_until_ready(style(x))
    loss = jax.block_until_ready(style.loss)

    G_ref = _reference_gram(x)
    T_ref = _reference_gram(target_feature)
    loss_ref = jnp.mean((G_ref - T_ref) ** 2)
    G_pallas = jax.block_until_ready(gram_matrix(x))

    assert out.shape == x.shape
    assert bool(jnp.allclose(out, x))
    assert bool(jnp.allclose(G_pallas, G_ref, rtol=1e-4, atol=1e-5)), "gram mismatch"
    assert bool(jnp.allclose(loss, loss_ref, rtol=1e-4, atol=1e-6)), (loss, loss_ref)

    # --- Exercise the tail-masking path (HW=324 not a multiple of the 128-wide tile) ---
    xb = jax.random.normal(k3, (2, 4, 18, 18), dtype=jnp.float32)
    Gb = jax.block_until_ready(gram_matrix(xb, max_tile_bytes=4 * 128 * 4))
    assert bool(jnp.allclose(Gb, _reference_gram(xb), rtol=1e-4, atol=1e-5)), "tail-mask mismatch"

    # --- Exercise the B==1 two-way HW split (v7x megacore path), incl. clamped block ---
    xs = jax.random.normal(k4, (1, 4, 18, 18), dtype=jnp.float32)
    Gs = jax.block_until_ready(gram_matrix(xs, max_tile_bytes=4 * 128 * 4))
    assert bool(jnp.allclose(Gs, _reference_gram(xs), rtol=1e-4, atol=1e-5)), "split mismatch"

    print("KERNEL_OK")
</pallas_src>

<mosaic_0001>
module attributes {stable_mosaic.version = 11 : i64} {
  func.func @_gram_kernel(%arg0: i32, %arg1: i32, %arg2: memref<1x4x256xf32, #tpu.memory_space<vmem>>, %arg3: memref<1x4x4xf32, #tpu.memory_space<vmem>>) attributes {dimension_semantics = [#tpu.dimension_semantics<parallel>, #tpu.dimension_semantics<arbitrary>], iteration_bounds = array<i64: 2, 1>, scalar_prefetch = 0 : i64, scratch_operands = 0 : i64, tpu.core_type = #tpu.core_type<tc>, window_params = [{transform_indices = @transform_0, window_bounds = array<i64: 1, 4, 256>}, {transform_indices = @transform_1, window_bounds = array<i64: 1, 4, 4>}]} {
    %c0_i32 = arith.constant 0 : i32
    %0 = arith.cmpi eq, %arg1, %c0_i32 : i32
    %1 = arith.extui %0 : i1 to i32
    %c0_i32_0 = arith.constant 0 : i32
    %2 = arith.cmpi ne, %1, %c0_i32_0 : i32
    scf.if %2 {
      %cst_11 = arith.constant 0.000000e+00 : f32
      %15 = vector.broadcast %cst_11 : f32 to vector<1x4x4xf32>
      %c0_12 = arith.constant 0 : index
      %c0_13 = arith.constant 0 : index
      %c0_14 = arith.constant 0 : index
      %16 = vector.load %arg3[%c0_12, %c0_13, %c0_14] : memref<1x4x4xf32, #tpu.memory_space<vmem>>, vector<1x4x4xf32>
      tpu.vector_store %arg3[%c0_12, %c0_13, %c0_14], %15 {strides = array<i32>} : memref<1x4x4xf32, #tpu.memory_space<vmem>>, vector<1x4x4xf32>,
    } else {
    }
    %c0 = arith.constant 0 : index
    %c0_1 = arith.constant 0 : index
    %c0_2 = arith.constant 0 : index
    %3 = vector.load %arg2[%c0, %c0_1, %c0_2] : memref<1x4x256xf32, #tpu.memory_space<vmem>>, vector<1x4x256xf32>
    %4 = vector.shape_cast %3 : vector<1x4x256xf32> to vector<4x256xf32>
    %c0_3 = arith.constant 0 : index
    %c0_4 = arith.constant 0 : index
    %c0_5 = arith.constant 0 : index
    %5 = vector.load %arg3[%c0_3, %c0_4, %c0_5] : memref<1x4x4xf32, #tpu.memory_space<vmem>>, vector<1x4x4xf32>
    %6 = vector.shape_cast %5 : vector<1x4x4xf32> to vector<4x4xf32>
    %cst = arith.constant dense<0.000000e+00> : vector<4x4xf32>
    %7 = tpu.matmul %4, %4, %cst {dimension_numbers = #tpu.dot_dimension_numbers<[1], [1], [0], [0], [0, 0, 1, 0], [], []>} : vector<4x256xf32>, vector<4x256xf32>, vector<4x4xf32> -> vector<4x4xf32>
    %8 = arith.addf %6, %7 : vector<4x4xf32>
    %c0_6 = arith.constant 0 : index
    %c0_7 = arith.constant 0 : index
    %c0_8 = arith.constant 0 : index
    %9 = vector.load %arg3[%c0_6, %c0_7, %c0_8] : memref<1x4x4xf32, #tpu.memory_space<vmem>>, vector<1x4x4xf32>
    %10 = vector.shape_cast %9 : vector<1x4x4xf32> to vector<4x4xf32>
    %11 = vector.shape_cast %8 : vector<4x4xf32> to vector<1x4x4xf32>
    tpu.vector_store %arg3[%c0_6, %c0_7, %c0_8], %11 {strides = array<i32>} : memref<1x4x4xf32, #tpu.memory_space<vmem>>, vector<1x4x4xf32>,
    %c0_i32_9 = arith.constant 0 : i32
    %12 = arith.cmpi eq, %arg1, %c0_i32_9 : i32
    %13 = arith.extui %12 : i1 to i32
    %c0_i32_10 = arith.constant 0 : i32
    %14 = arith.cmpi ne, %13, %c0_i32_10 : i32
    scf.if %14 {
      %c0_11 = arith.constant 0 : index
      %c0_12 = arith.constant 0 : index
      %c0_13 = arith.constant 0 : index
      %15 = vector.load %arg3[%c0_11, %c0_12, %c0_13] : memref<1x4x4xf32, #tpu.memory_space<vmem>>, vector<1x4x4xf32>
      %cst_14 = arith.constant 9.765625E-4 : f32
      %16 = vector.broadcast %cst_14 : f32 to vector<1x4x4xf32>
      %17 = arith.mulf %15, %16 : vector<1x4x4xf32>
      %c0_15 = arith.constant 0 : index
      %c0_16 = arith.constant 0 : index
      %c0_17 = arith.constant 0 : index
      %18 = vector.load %arg3[%c0_15, %c0_16, %c0_17] : memref<1x4x4xf32, #tpu.memory_space<vmem>>, vector<1x4x4xf32>
      tpu.vector_store %arg3[%c0_15, %c0_16, %c0_17], %17 {strides = array<i32>} : memref<1x4x4xf32, #tpu.memory_space<vmem>>, vector<1x4x4xf32>,
    } else {
    }
    return
  }
  func.func @transform_0(%arg0: i32, %arg1: i32) -> (i32, i32, i32) {
    %c0_i32 = arith.constant 0 : i32
    %c0_i32_0 = arith.constant 0 : i32
    return %arg0, %c0_i32, %arg1 : i32, i32, i32
  }
  func.func @transform_1(%arg0: i32, %arg1: i32) -> (i32, i32, i32) {
    %c0_i32 = arith.constant 0 : i32
    %c0_i32_0 = arith.constant 0 : i32
    %c0_i32_1 = arith.constant 0 : i32
    return %arg0, %c0_i32, %c0_i32_0 : i32, i32, i32
  }
}

</mosaic_0001>

<bundles_post_ra>
// kernel: tpu_custom_call.1
= control target key start
LH: loop header
LB: loop body
LE: loop exit
PB: predicated region body
PF: predicated region fallthrough
CT: control target
= control target key end

     0   :  { %6 = vsyncpa [#allocation3], 0  ;;  %s675_s0 = inlined_call_operand.hbm [shape: f32[2,4,256], index: 0, kind: input, shape index: {}]   ;;  %s676_s1 = inlined_call_operand.hbm [shape: f32[2,4,4], index: 1, kind: output, shape index: {}]  }
   0x1   :  { %8 = vsyncpa [#allocation3 + $0x1], 0 }
   0x2   :  { %9 = vsyncpa [#allocation4], 0 }
   0x3   :  { %11 = vsyncpa [#allocation4 + $0x1], 0  ;;  %s537_s6 = smov 0   ;;  %s539_s7 = smov 0  }
   0x4   :  { %s541_s8 = smov 0   ;;  %s543_s9 = smov 0  }
   0x5   :  { %s545_s10 = smov 0   ;;  %s547_s11 = smov 0  }
   0x6 LB: > { %s335_s12 = sadd.s32 4294967295, %s522_s11   ;;  %s336_s13 = sadd.s32 4294967294, %s522_s11   ;;  %s522_s11 = sphi %s547_s11, %s17_s11   ;;  %s518_s10 = sphi %s545_s10, %s688_s10   ;;  %s514_s9 = sphi %s543_s9, %s687_s9   ;;  %s510_s8 = sphi %s541_s8, %s686_s8   ;;  %s506_s7 = sphi %s539_s7, %s685_s7   ;;  %s502_s6 = sphi %s537_s6, %s684_s6  }
   0x7   : > { %s29_s14 = sadd.s32 1, %s518_s10  ;;  %s38_s15 = sadd.s32 1, %s510_s8 }
   0x8   : > { %p31_p0 = scmp.ge.s32.totalorder %s29_s14, 2  ;;  %p45_p1 = scmp.ne.s32.totalorder %s510_s8, %s506_s7 }
   0x9   : > { %p46_p2 = scmp.eq.s32.totalorder %s522_s11, 0  ;;  %p51_p3 = scmp.ne.s32.totalorder %s506_s7, %s502_s6 }
   0xa   : > { %s690_s14 = smov (%p31_p0, %s29_s14), 0  ;;  %p52_p5 = scmp.eq.s32.totalorder %s335_s12, 0 }
   0xb   : > { %p578_p4 = por %p46_p2, %p45_p1  ;;  %s33_s17 = ssub.s32 %s518_s10, %s690_s14 }
   0xc   : > { %p75_p6 = scmp.eq.s32.totalorder %s335_s12, 1  ;;  %p36_p7 = scmp.eq.s32.totalorder %s33_s17, 0 }
   0xd   : > { %p584_p8 = por %p52_p5, %p51_p3  ;;  %p81_p10 = scmp.eq.s32.totalorder %s336_s13, 1 }
   0xe   : > { %p588_p9 = por %p75_p6, %p45_p1  ;;  %p362_p13 = scmp.lt.s32.totalorder %s522_s11, 2 }
   0xf   : > { %s593_s20 = scalar_select %p36_p7, %s510_s8, %s38_s15  }
  0x10   : > { %p595_p11 = por %p81_p10, %p51_p3  ;;  %s101_s22 = sand.u32 1, %s510_s8  }
  0x11   : > { %s339_s23 = sshll.u32 %s101_s22, 3  ;;  %s349_s24 = sshll.u32 %s518_s10, 7 }
  0x12   : > { %s680_s21 = scalar_select %p595_p11, 1, 0 }
  0x13   : > { %s113_s27 = scalar_lea.hbm %s675_s0, %s349_s24  ;;  %s105_s28 = scalar_lea.vmem [#allocation2], %s339_s23 }
  0x14   : > { %s115_s29 = sshll.u32 %s105_s28, 4  ;;  %p608_p0 = pnand %p362_p13, %p578_p4  ;;  %s116_s29 = int_to_ptr.vmem [resolvable:$true] %s115_s29 }
  0x15   : > { %p342_p1 = scmp.ge.s32.totalorder %s522_s11, 1  ;;  %p120_p2 = scmp.lt.s32.totalorder %s522_s11, 3 }
  0x16   : > { %s102_s2 = scalar_lea.sflag [#allocation3], %s101_s22  ;;  %p416_p3 = pneg %p608_p0 }
  0x17   : > { %s427_s3 = scalar_lea.vmem %s116_s29, 128  ;;  %s524_s4 = smov [#allocation2]  }
  0x18   : > { %p428_p5 = scmp.ne.s32.totalorder %s116_s29, %s427_s3  ;;  %s432_s5 = sshll.u32 %s524_s4, 4  ;;  %s433_s5 = int_to_ptr.vmem [resolvable:$false] %s432_s5 }
  0x19   : > { %s434_s12 = scalar_lea.vmem %s433_s5, 256  ;;  %p435_p10 = scmp.lt.s32.totalorder %s116_s29, %s433_s5 }
  0x1a   : > { %p430_p6 = pnand %p428_p5, %p416_p3  ;;  %p436_p12 = scmp.lt.s32.totalorder %s434_s12, %s427_s3 }
  0x1c   : > { %p431_p7 = pneg %p430_p6  ;;  %p437_p4 = por %p436_p12, %p435_p10 }
  0x1e   : > { %p438_p13 = pnand %p437_p4, %p431_p7 }
  0x20   : > { %441 = shalt.err (!%p438_p13)
}
  0x21   : > { %357 = dma.hbm_to_vmem [thread:$0]  (!%p608_p0), %s113_s27, 128, %s116_s29, %s102_s2  }
  0x22   : > { %p121_p11 = pnand %p342_p1, %p120_p2 }
  0x23   : > { %s623_s13 = sand.u32 (!%p121_p11), 1, %s506_s7  }
  0x24   : > { %124 = sbr.rel (%p121_p11) target bundleno = 267 (0x10b), region = 24  ;;  %s343_s15 = sshll.u32 (!%p121_p11), %s623_s13, 3 }
  0x25   : > { %s127_s16 = scalar_lea.sflag (!%p121_p11), [#allocation3], %s623_s13  ;;  %s130_s17 = scalar_lea.vmem (!%p121_p11), [#allocation2], %s343_s15 }
  0x29   : > { %493 = dma.done.wait (%p584_p8), %s127_s16, 128  }
  0x2a   : > { %495 = vsyncadd (%p584_p8), %s127_s16, 4294967168  ;;  %s344_s22 = sshll.u32 %s623_s13, 2  ;;  %vm154_vm0 = vcmask 27648   ;;  %v525_v0 = vmov 0.0   ;;  %v156_v1 = vld [vmem:[%s130_s17] sm:$0xff]  ;;  %s346_s18 = sshll.u32 %s514_s9, 6 }
  0x2b   : > { %s148_s23 = scalar_lea.vmem [#allocation5], %s344_s22  ;;  %v159_v2 = vcombine.high %v156_v1, %v156_v1  ;;  %s252_s27 = scalar_lea.hbm %s676_s1, %s346_s18 }
  0x2c   : > { %155 = vst.msk [vmem:[%s148_s23] sm:$0xf] %vm154_vm0, %v525_v0  ;;  %s254_s24 = sshll.u32 %s148_s23, 4  ;;  %s241_s28 = scalar_lea.sflag [#allocation4], %s623_s13  ;;  %s255_s24 = int_to_ptr.vmem [resolvable:$true] %s254_s24 }
  0x2d   : > { %191 = vmatprep.subr.mxu0 %v159_v2  ;;  %225 = vmatprep.mubr.f32.mxu0 %v159_v2  ;;  %s442_s29 = scalar_lea.vmem %s255_s24, 64  ;;  %s526_s30 = smov [#allocation5]  }
  0x2e   : > { %192 = vmatpush1.xpose.msra.mxu0 %v156_v1  ;;  %p443_p8 = scmp.ne.s32.totalorder %s255_s24, %s442_s29  ;;  %s446_s2 = sshll.u32 %s526_s30, 4  ;;  %s447_s2 = int_to_ptr.vmem [resolvable:$false] %s446_s2 }
  0x2f   : > { %s448_s9 = scalar_lea.vmem %s447_s2, 128  ;;  %p449_p0 = scmp.lt.s32.totalorder %s255_s24, %s447_s2 }
  0x30   : > { %p444_p11 = pnand %p443_p8, %p588_p9  ;;  %p450_p1 = scmp.lt.s32.totalorder %s448_s9, %s442_s29 }
  0x31   : > { %226 = vmatmul.mubr.f32.vlgmr.msra.gmra.mxu0 %v156_v1 }
  0x32   : > { %p445_p12 = pneg %p444_p11  ;;  %p451_p2 = por %p450_p1, %p449_p0 }
  0x33   : > { %v157_v3 = vld [vmem:[%s148_s23] sm:$0xf] }
  0x34   : > { %p452_p3 = pnand %p451_p2, %p445_p12 }
  0xf1   : > { %v227_v4 = vpop.f32.mrf.mxu0 }
  0xf2   : > { %v231_v5 = vadd.f32 %v227_v4, %v157_v3 }
  0xf3   : > { %v229_v6 = vpop.f32.mrf.mxu0 }
  0xf4   : > { %233 = vst.msk [vmem:[%s148_s23] sm:$0xf] %vm154_vm0, %v231_v5 }
  0xfb   : > { %v237_v7 = vld [vmem:[%s148_s23] sm:$0xf] }
  0xfc   : > { %v238_v8 = vmul.f32 0.0009765625, %v237_v7 }
  0xfe   : > { %239 = vst.msk [vmem:[%s148_s23] sm:$0xf] %vm154_vm0, %v238_v8 }
  0xff   : > { %455 = shalt.err (!%p452_p3)
}
 0x100   : > { %s456_s3 = scalar_lea.hbm %s252_s27, 64  ;;  %s460_s12 = scalar_lea.hbm %s676_s1, 128 }
 0x101   : > { %p457_p5 = scmp.ne.s32.totalorder %s252_s27, %s456_s3  ;;  %p461_p10 = scmp.lt.s32.totalorder %s252_s27, %s676_s1 }
 0x102   : > { %p462_p4 = scmp.lt.s32.totalorder %s460_s12, %s456_s3 }
 0x103   : > { %p458_p6 = pnand %p457_p5, %p588_p9 }
 0x104   : > { %p463_p13 = por %p462_p4, %p461_p10 }
 0x105   : > { %p459_p7 = pneg %p458_p6 }
 0x107   : > { %p464_p8 = pnand %p463_p13, %p459_p7 }
 0x109   : > { %467 = shalt.err (!%p464_p8)
}
 0x10a   : > { %352 = dma.vmem_to_hbm [thread:$0]  (%p588_p9), %s255_s24, 64, %s252_s27, %s241_s28  }
 0x10b PF: > { %s266_s16 = sand.u32 1, %s502_s6   ;;  %p682_p11 = scmp.ne.s32.totalorder %s680_s21, 0 }
 0x10c   : > { %p683_p12 = scmp.ge.s32.totalorder %s522_s11, 2  ;;  %s267_s17 = scalar_lea.sflag [#allocation4], %s266_s16 }
 0x10e   : > { %p359_p0 = pnand %p683_p12, %p682_p11 }
 0x110   : > { %p360_p1 = pneg %p359_p0 }
 0x112   : > { %497 = dma.done.wait (%p360_p1), %s267_s17, 64  }
 0x113   : > { %499 = vsyncadd (%p360_p1), %s267_s17, 4294967232  ;;  %s17_s11 = sadd.s32 1, %s522_s11   ;;  %s684_s6 = smov %s506_s7 }
 0x114   : > { %p14_p2 = scmp.ge.s32.totalorder %s17_s11, 4   ;;  %s685_s7 = smov %s510_s8 }
 0x115   : > { %s686_s8 = smov %s593_s20  ;;  %s687_s9 = smov %s518_s10 }
 0x116   : > { %s688_s10 = smov %s690_s14  ;;  %16 = sbr.rel (!%p14_p2) target bundleno = 6 (0x6), region = 77 }
 0x11b   :  { %272 = vsyncpa [#allocation3], 1 }
 0x11c   :  { %274 = vsyncpa [#allocation3 + $0x1], 1 }
 0x11d   :  { %275 = vsyncpa [#allocation4], 1 }
 0x11e   :  { %277 = vsyncpa [#allocation4 + $0x1], 1 }

</bundles_post_ra>
